<compile_context>
chip_gen: v7x
topology: tpu7x:2x2x1
jax: 0.10.0
libtpu: 0.0.40
codegen_flags: <defaults>
</compile_context>

<pallas_src>
import functools

import jax
import jax.numpy as jnp
import numpy as np
from jax.experimental import pallas as pl
from jax.experimental.pallas import tpu as pltpu


def _multi_recall_kernel(logits_ref, labels_ref, tp_ref, sup_ref, *, cast_to_f32):
    j = pl.program_id(1)  # reduction axis (batch tiles owned by this core)

    @pl.when(j == 0)
    def _init():
        tp_ref[...] = jnp.zeros_like(tp_ref)
        sup_ref[...] = jnp.zeros_like(sup_ref)

    x = logits_ref[...]                                  # (TN, C)
    if cast_to_f32:
        x = x.astype(jnp.float32)
    tn, c = x.shape

    # argmax along classes with first-index tie-break (matches torch argmax).
    idx = jax.lax.broadcasted_iota(jnp.int32, (tn, c), 1)
    row_max = jnp.max(x, axis=1, keepdims=True)
    is_max = x >= row_max
    pred_col = jnp.min(jnp.where(is_max, idx, jnp.int32(c)),
                       axis=1, keepdims=True)            # (TN, 1)

    # labels arrive lane-dense as (1, TN); relayout to a per-row column.
    lbl_col = jnp.transpose(labels_ref[...])             # (TN, 1) int32
    lbl_oh = idx == lbl_col                              # (TN, C) target one-hot
    hit = lbl_oh & (idx == pred_col)                     # (TN, C) true positives

    # Exact integer count accumulation (no f32 +1.0 saturation past 2^24).
    tp_ref[...] += jnp.sum(hit.astype(jnp.int32), axis=0, keepdims=True)[None]
    sup_ref[...] += jnp.sum(lbl_oh.astype(jnp.int32), axis=0, keepdims=True)[None]


def _needs_f32_cast(dtype) -> bool:
    d = jnp.dtype(dtype)
    if d == jnp.dtype(jnp.float32):
        return False
    if d == jnp.dtype(jnp.bfloat16):
        # bf16 VALU exists on v6e/v7x; v5e and older need the f32 path.
        try:
            kind = jax.devices()[0].device_kind.lower()
        except Exception:
            return True
        return any(t in kind for t in ("v2", "v3", "v4", "v5"))
    # Other dtypes (f16 / ints / fp8): compare in f32 for safe lowering.
    return True


@functools.partial(
    jax.jit,
    static_argnames=("tn", "num_tiles", "tiles_per_core", "num_cores", "cast_to_f32"),
)
def _multi_recall_impl(logits, labels, *, tn, num_tiles, tiles_per_core,
                       num_cores, cast_to_f32):
    n, c = logits.shape
    n_cover = num_cores * tiles_per_core * tn

    # Lane-dense labels row. Pad positions carry the out-of-range label `c`,
    # so overhanging / duplicated logits blocks hit neither TP nor support.
    labels_row = jnp.full((1, n_cover), c, dtype=jnp.int32)
    labels_row = labels_row.at[0, :n].set(labels)

    last_blk = num_tiles - 1

    def logits_map(p, j):
        # Clamp: unused trailing grid steps re-read an in-bounds tile whose
        # (padded, out-of-range) labels contribute nothing.
        return (jnp.minimum(p * tiles_per_core + j, last_blk), 0)

    def labels_map(p, j):
        return (0, p * tiles_per_core + j)

    def out_map(p, j):
        return (p, 0, 0)

    kernel = functools.partial(_multi_recall_kernel, cast_to_f32=cast_to_f32)

    tp, sup = pl.pallas_call(
        kernel,
        out_shape=(
            jax.ShapeDtypeStruct((num_cores, 1, c), jnp.int32),
            jax.ShapeDtypeStruct((num_cores, 1, c), jnp.int32),
        ),
        grid=(num_cores, tiles_per_core),
        in_specs=[
            pl.BlockSpec((tn, c), logits_map),          # logits tile (no HBM pad copy)
            pl.BlockSpec((1, tn), labels_map),          # lane-dense labels tile
        ],
        out_specs=(
            pl.BlockSpec((1, 1, c), out_map),           # per-core resident TP acc
            pl.BlockSpec((1, 1, c), out_map),           # per-core resident support acc
        ),
        compiler_params=pltpu.CompilerParams(
            dimension_semantics=("parallel", "arbitrary"),
            vmem_limit_bytes=32 * 1024 * 1024,
        ),
    )(logits, labels_row)

    # Tiny epilogue: sum per-core partials, per-class recall (0/0 -> 0), macro mean.
    tp_f = tp.sum(axis=(0, 1)).astype(jnp.float32)
    sup_f = sup.sum(axis=(0, 1)).astype(jnp.float32)
    recall_c = jnp.where(sup_f > 0, tp_f / jnp.maximum(sup_f, 1.0), 0.0)
    return jnp.mean(recall_c)


def multi_recall(logits: jax.Array, labels: jax.Array, num_classes: int,
                 average: str = "macro", tile_rows: int | None = None) -> jax.Array:
    """Pallas equivalent of MultiRecall(num_classes, average).forward(logits, labels)."""
    if average in ("micro", "weighted"):
        raise NotImplementedError(f"average='{average}' not implemented (matches reference)")
    if average != "macro":
        raise ValueError(f"unknown average: {average!r}")
    assert logits.ndim == 2 and logits.shape[1] == num_classes
    n, c = logits.shape

    # Adaptive batch tile: ~2 MiB per lane-padded buffer (intermediates are
    # 32-bit wide regardless of input dtype), multiple of 128, capped at 8192.
    lane_c = max(128, ((c + 127) // 128) * 128)
    if tile_rows is None:
        budget_bytes = 2 * 1024 * 1024
        cap = (budget_bytes // (lane_c * 4)) // 128 * 128
        cap = int(min(8192, max(128, cap)))
    else:
        cap = max(128, ((int(tile_rows) + 127) // 128) * 128)

    if n <= cap:
        tn = max(8, ((n + 7) // 8) * 8)     # single tile: just round rows up to sublane
        num_tiles = 1
    else:
        tn = cap                             # multi-tile: lane-aligned labels blocks
        num_tiles = (n + tn - 1) // tn

    num_cores = 2 if num_tiles >= 2 else 1   # v7x megacore split; harmless elsewhere
    tiles_per_core = (num_tiles + num_cores - 1) // num_cores

    return _multi_recall_impl(
        logits, labels.astype(jnp.int32).reshape(-1),
        tn=tn, num_tiles=num_tiles, tiles_per_core=tiles_per_core,
        num_cores=num_cores, cast_to_f32=_needs_f32_cast(logits.dtype))


def _reference_numpy(logits: np.ndarray, labels: np.ndarray, num_classes: int) -> float:
    x = logits.astype(np.float64) - logits.astype(np.float64).max(axis=1, keepdims=True)
    p = np.exp(x) / np.exp(x).sum(axis=1, keepdims=True)
    pred = p.argmax(axis=1)
    recalls = []
    for cls in range(num_classes):
        sup = np.sum(labels == cls)
        tp = np.sum((labels == cls) & (pred == cls))
        recalls.append(0.0 if sup == 0 else tp / sup)
    return float(np.mean(recalls))


if __name__ == "__main__":
    key = jax.random.PRNGKey(0)

    # Case 1: small shape consistent with the module (batch=16, classes=8),
    # single tile, single core.
    num_classes = 8
    n = 16
    k1, k2, k3, k4 = jax.random.split(key, 4)
    logits = jax.random.normal(k1, (n, num_classes), dtype=jnp.float32)
    labels = jax.random.randint(k2, (n,), 0, num_classes, dtype=jnp.int32)

    result = jax.block_until_ready(multi_recall(logits, labels, num_classes))
    ref = _reference_numpy(np.asarray(logits), np.asarray(labels), num_classes)
    np.testing.assert_allclose(float(result), ref, rtol=1e-5, atol=1e-6)

    # Case 2: exercise the two-core split, multi-tile accumulation, the
    # partial (overhanging) last logits block and the clamped duplicate tile.
    num_classes2, n2 = 5, 260
    logits2 = jax.random.normal(k3, (n2, num_classes2), dtype=jnp.float32)
    labels2 = jax.random.randint(k4, (n2,), 0, num_classes2, dtype=jnp.int32)
    result2 = jax.block_until_ready(
        multi_recall(logits2, labels2, num_classes2, tile_rows=128))
    ref2 = _reference_numpy(np.asarray(logits2), np.asarray(labels2), num_classes2)
    np.testing.assert_allclose(float(result2), ref2, rtol=1e-5, atol=1e-6)

    print("KERNEL_OK")
</pallas_src>

<mosaic_0001>
module attributes {stable_mosaic.version = 11 : i64} {
  func.func @_multi_recall_kernel(%arg0: i32, %arg1: i32, %arg2: memref<16x8xf32, #tpu.memory_space<vmem>>, %arg3: memref<1x16xi32, #tpu.memory_space<vmem>>, %arg4: memref<1x1x8xi32, #tpu.memory_space<vmem>>, %arg5: memref<1x1x8xi32, #tpu.memory_space<vmem>>) attributes {dimension_semantics = [#tpu.dimension_semantics<parallel>, #tpu.dimension_semantics<arbitrary>], iteration_bounds = array<i64: 1, 1>, scalar_prefetch = 0 : i64, scratch_operands = 0 : i64, tpu.core_type = #tpu.core_type<tc>, window_params = [{transform_indices = @transform_0, window_bounds = array<i64: 16, 8>}, {transform_indices = @transform_1, window_bounds = array<i64: 1, 16>}, {transform_indices = @transform_2, window_bounds = array<i64: 1, 1, 8>}, {transform_indices = @transform_3, window_bounds = array<i64: 1, 1, 8>}]} {
    %c0_i32 = arith.constant 0 : i32
    %0 = arith.cmpi eq, %arg1, %c0_i32 : i32
    %1 = arith.extui %0 : i1 to i32
    %c0_i32_0 = arith.constant 0 : i32
    %2 = arith.cmpi ne, %1, %c0_i32_0 : i32
    scf.if %2 {
      %c0_i32_19 = arith.constant 0 : i32
      %34 = vector.broadcast %c0_i32_19 : i32 to vector<1x1x8xi32>
      %c0_20 = arith.constant 0 : index
      %c0_21 = arith.constant 0 : index
      %c0_22 = arith.constant 0 : index
      %35 = vector.load %arg4[%c0_20, %c0_21, %c0_22] : memref<1x1x8xi32, #tpu.memory_space<vmem>>, vector<1x1x8xi32>
      tpu.vector_store %arg4[%c0_20, %c0_21, %c0_22], %34 {strides = array<i32>} : memref<1x1x8xi32, #tpu.memory_space<vmem>>, vector<1x1x8xi32>,
      %c0_i32_23 = arith.constant 0 : i32
      %36 = vector.broadcast %c0_i32_23 : i32 to vector<1x1x8xi32>
      %c0_24 = arith.constant 0 : index
      %c0_25 = arith.constant 0 : index
      %c0_26 = arith.constant 0 : index
      %37 = vector.load %arg5[%c0_24, %c0_25, %c0_26] : memref<1x1x8xi32, #tpu.memory_space<vmem>>, vector<1x1x8xi32>
      tpu.vector_store %arg5[%c0_24, %c0_25, %c0_26], %36 {strides = array<i32>} : memref<1x1x8xi32, #tpu.memory_space<vmem>>, vector<1x1x8xi32>,
    } else {
    }
    %c0 = arith.constant 0 : index
    %c0_1 = arith.constant 0 : index
    %3 = vector.load %arg2[%c0, %c0_1] : memref<16x8xf32, #tpu.memory_space<vmem>>, vector<16x8xf32>
    %4 = tpu.iota {dimensions = array<i32: 1>} : vector<16x8xi32>
    %cst = arith.constant dense<0xFF800000> : vector<16xf32>
    %5 = vector.multi_reduction <maximumf>, %3, %cst [1] : vector<16x8xf32> to vector<16xf32>
    %6 = vector.shape_cast %5 : vector<16xf32> to vector<16x1xf32>
    %7 = vector.broadcast %6 : vector<16x1xf32> to vector<16x8xf32>
    %8 = arith.cmpf oge, %3, %7 : vector<16x8xf32>
    %c8_i32 = arith.constant 8 : i32
    %9 = vector.broadcast %c8_i32 : i32 to vector<16x8xi32>
    %10 = arith.select %8, %4, %9 : vector<16x8xi1>, vector<16x8xi32>
    %cst_2 = arith.constant dense<2147483647> : vector<16xi32>
    %11 = vector.multi_reduction <minsi>, %10, %cst_2 [1] : vector<16x8xi32> to vector<16xi32>
    %12 = vector.shape_cast %11 : vector<16xi32> to vector<16x1xi32>
    %c0_3 = arith.constant 0 : index
    %c0_4 = arith.constant 0 : index
    %13 = vector.load %arg3[%c0_3, %c0_4] : memref<1x16xi32, #tpu.memory_space<vmem>>, vector<1x16xi32>
    %14 = tpu.transpose %13, [1, 0] : vector<1x16xi32> -> vector<16x1xi32>
    %15 = vector.broadcast %14 : vector<16x1xi32> to vector<16x8xi32>
    %16 = arith.cmpi eq, %4, %15 : vector<16x8xi32>
    %17 = vector.broadcast %12 : vector<16x1xi32> to vector<16x8xi32>
    %18 = arith.cmpi eq, %4, %17 : vector<16x8xi32>
    %19 = arith.andi %16, %18 : vector<16x8xi1>
    %c0_5 = arith.constant 0 : index
    %c0_6 = arith.constant 0 : index
    %c0_7 = arith.constant 0 : index
    %20 = vector.load %arg4[%c0_5, %c0_6, %c0_7] : memref<1x1x8xi32, #tpu.memory_space<vmem>>, vector<1x1x8xi32>
    %21 = arith.extui %19 : vector<16x8xi1> to vector<16x8xi32>
    %cst_8 = arith.constant dense<0> : vector<8xi32>
    %22 = vector.multi_reduction <add>, %21, %cst_8 [0] : vector<16x8xi32> to vector<8xi32>
    %23 = vector.shape_cast %22 : vector<8xi32> to vector<1x8xi32>
    %24 = vector.shape_cast %23 : vector<1x8xi32> to vector<1x1x8xi32>
    %25 = arith.addi %20, %24 : vector<1x1x8xi32>
    %c0_9 = arith.constant 0 : index
    %c0_10 = arith.constant 0 : index
    %c0_11 = arith.constant 0 : index
    %26 = vector.load %arg4[%c0_9, %c0_10, %c0_11] : memref<1x1x8xi32, #tpu.memory_space<vmem>>, vector<1x1x8xi32>
    tpu.vector_store %arg4[%c0_9, %c0_10, %c0_11], %25 {strides = array<i32>} : memref<1x1x8xi32, #tpu.memory_space<vmem>>, vector<1x1x8xi32>,
    %c0_12 = arith.constant 0 : index
    %c0_13 = arith.constant 0 : index
    %c0_14 = arith.constant 0 : index
    %27 = vector.load %arg5[%c0_12, %c0_13, %c0_14] : memref<1x1x8xi32, #tpu.memory_space<vmem>>, vector<1x1x8xi32>
    %28 = arith.extui %16 : vector<16x8xi1> to vector<16x8xi32>
    %cst_15 = arith.constant dense<0> : vector<8xi32>
    %29 = vector.multi_reduction <add>, %28, %cst_15 [0] : vector<16x8xi32> to vector<8xi32>
    %30 = vector.shape_cast %29 : vector<8xi32> to vector<1x8xi32>
    %31 = vector.shape_cast %30 : vector<1x8xi32> to vector<1x1x8xi32>
    %32 = arith.addi %27, %31 : vector<1x1x8xi32>
    %c0_16 = arith.constant 0 : index
    %c0_17 = arith.constant 0 : index
    %c0_18 = arith.constant 0 : index
    %33 = vector.load %arg5[%c0_16, %c0_17, %c0_18] : memref<1x1x8xi32, #tpu.memory_space<vmem>>, vector<1x1x8xi32>
    tpu.vector_store %arg5[%c0_16, %c0_17, %c0_18], %32 {strides = array<i32>} : memref<1x1x8xi32, #tpu.memory_space<vmem>>, vector<1x1x8xi32>,
    return
  }
  func.func @transform_0(%arg0: i32, %arg1: i32) -> (i32, i32) {
    %c1_i32 = arith.constant 1 : i32
    %0 = arith.muli %arg0, %c1_i32 : i32
    %1 = arith.addi %0, %arg1 : i32
    %c0_i32 = arith.constant 0 : i32
    %2 = arith.minsi %1, %c0_i32 : i32
    %c0_i32_0 = arith.constant 0 : i32
    %c0_i32_1 = arith.constant 0 : i32
    return %2, %c0_i32_0 : i32, i32
  }
  func.func @transform_1(%arg0: i32, %arg1: i32) -> (i32, i32) {
    %c1_i32 = arith.constant 1 : i32
    %0 = arith.muli %arg0, %c1_i32 : i32
    %1 = arith.addi %0, %arg1 : i32
    %c0_i32 = arith.constant 0 : i32
    %c0_i32_0 = arith.constant 0 : i32
    return %c0_i32, %1 : i32, i32
  }
  func.func @transform_2(%arg0: i32, %arg1: i32) -> (i32, i32, i32) {
    %c0_i32 = arith.constant 0 : i32
    %c0_i32_0 = arith.constant 0 : i32
    %c0_i32_1 = arith.constant 0 : i32
    return %arg0, %c0_i32, %c0_i32_0 : i32, i32, i32
  }
  func.func @transform_3(%arg0: i32, %arg1: i32) -> (i32, i32, i32) {
    %c0_i32 = arith.constant 0 : i32
    %c0_i32_0 = arith.constant 0 : i32
    %c0_i32_1 = arith.constant 0 : i32
    return %arg0, %c0_i32, %c0_i32_0 : i32, i32, i32
  }
}

</mosaic_0001>

<bundles_post_ra>
// kernel: _multi_recall_impl.1
= control target key start
LH: loop header
LB: loop body
LE: loop exit
PB: predicated region body
PF: predicated region fallthrough
CT: control target
= control target key end

     0   :  { %vm70_vm0 = vcmask 64512   ;;  %v205_v4 = vmov 0   ;;  %v68_v6 = vlaneseq  ;;  %vm63_vm5 = vcmask 57344   ;;  %s273_s0 = inlined_call_operand.vmem [shape: f32[16,8], index: 0, kind: input, shape index: {}]   ;;  %s274_s1 = inlined_call_operand.vmem [shape: s32[1,16], index: 1, kind: input, shape index: {}]   ;;  %s275_s2 = inlined_call_operand.vmem [shape: s32[1,1,8], index: 2, kind: output, shape index: {0}]   ;;  %s276_s3 = inlined_call_operand.vmem [shape: s32[1,1,8], index: 3, kind: output, shape index: {1}]  }
   0x1   :  { %v66_v0 = vld [vmem:[%s273_s0] sm:$0xff]  ;;  %v67_v1 = vld [vmem:[%s273_s0 + $0x8] sm:$0xff]  ;;  %203 = vset.pattern.permute.xlu1 %v205_v4  ;;  %64 = vst.msk [vmem:[%s275_s2] sm:$0x1] %vm63_vm5, %v205_v4  ;;  %65 = vst.msk [vmem:[%s276_s3] sm:$0x1] %vm63_vm5, %v205_v4 }
   0x2   :  { %v71_v2 = vsel %vm70_vm0, %v66_v0, -inf  ;;  %v74_v3 = vsel %vm70_vm0, %v67_v1, -inf  ;;  %v111_v5 = vld [vmem:[%s274_s1] sm:$0x1]  ;;  %v69_v7 = vand.u32 127, %v68_v6 }
   0x3   :  { %72 = vmax.xlane.f32.xlu0 %v71_v2 }
   0x7   :  { %75 = vmax.xlane.f32.xlu0 %v74_v3 }
   0x8   :  { %v171_v59 = vld [vmem:[%s276_s3] sm:$0x1] }
   0x9   :  { %v156_v61 = vld [vmem:[%s275_s2] sm:$0x1] }
  0x34   :  { %112 = vxpose.xlu0.b32.start.end [1/1] (short) (narrow) %v111_v5, 16 }
  0x5d   :  { %204 = vset.pattern.permute.xlu0 %v205_v4 }
  0x90   :  { %v73_v8 = vpop.xlane.xlu0 %72 }
  0x91   :  { %vm77_vm1 = vcmp.ge.f32.partialorder %v66_v0, %v73_v8 }
  0x92   :  { %v79_v9 = vsel %vm77_vm1, %v69_v7, 8 }
  0x93   :  { %v81_v10 = vsel %vm70_vm0, %v79_v9, 2147483647 }
  0x94   :  { %v76_v11 = vpop.xlane.xlu0 %75  ;;  %v83_v12 = vshra.s32 %v81_v10, 16  ;;  %v82_v19 = vand.u32 65535, %v81_v10 }
  0x95   :  { %vm78_vm2 = vcmp.ge.f32.partialorder %v67_v1, %v76_v11 }
  0x96   :  { %v80_v13 = vsel %vm78_vm2, %v69_v7, 8  ;;  %v85_v14 = vcvt.s32.f32 %v83_v12  ;;  %v84_v21 = vcvt.s32.f32 %v82_v19 }
  0x97   :  { %v96_v15 = vsel %vm70_vm0, %v80_v13, 2147483647 }
  0x98   :  { %86 = vmin.xlane.f32.xlu1 %v85_v14  ;;  %v98_v16 = vshra.s32 %v96_v15, 16  ;;  %v97_v22 = vand.u32 65535, %v96_v15 }
  0x9a   :  { %v100_v17 = vcvt.s32.f32 %v98_v16  ;;  %v99_v25 = vcvt.s32.f32 %v97_v22 }
  0x9c   :  { %101 = vmin.xlane.f32.xlu1 %v100_v17 }
  0xb4   :  { %v128_v18 = vpop.trf.xlu0 }
  0xb5   :  { %145 = vperm.xlu1 %203, %v128_v18  }
  0xb8   :  { %v129_v27 = vpop.trf.xlu0 }
 0x125   :  { %v87_v20 = vpop.xlane.xlu1 %86 }
 0x126   :  { %vm88_vm3 = vcmp.eq.f32.partialorder %v85_v14, %v87_v20  ;;  %v93_v29 = vcvt.f32.s32 %v87_v20 }
 0x127   :  { %v89_v23 = vsel %vm88_vm3, %v84_v21, inf }
 0x128   :  { %90 = vmin.xlane.f32.xlu1 %v89_v23  ;;  %v94_v31 = vshll.u32 %v93_v29, 16 }
 0x129   :  { %v102_v24 = vpop.xlane.xlu1 %101 }
 0x12a   :  { %vm103_vm4 = vcmp.eq.f32.partialorder %v100_v17, %v102_v24  ;;  %v108_v32 = vcvt.f32.s32 %v102_v24 }
 0x12b   :  { %v104_v26 = vsel %vm103_vm4, %v99_v25, inf }
 0x12c   :  { %105 = vmin.xlane.f32.xlu1 %v104_v26  ;;  %v109_v36 = vshll.u32 %v108_v32, 16 }
 0x134   :  { %v146_v28 = vpop.permute.xlu1 %145 }
 0x135   :  { %vm150_vm6 = vcmp.eq.s32.totalorder %v69_v7, %v146_v28 }
 0x136   :  { %v172_v39 = vsel %vm150_vm6, 1, %v205_v4 }
 0x137   :  { %v174_v43 = vsel %vm70_vm0, %v172_v39, 0 }
 0x13d   :  { %148 = vperm.xlu1 %203, %v129_v27  }
 0x1b5   :  { %v91_v30 = vpop.xlane.xlu1 %90 }
 0x1b6   :  { %v92_v33 = vcvt.f32.s32 %v91_v30 }
 0x1b8   :  { %v95_v34 = vadd.s32 %v94_v31, %v92_v33 }
 0x1b9   :  { %v106_v35 = vpop.xlane.xlu1 %105 }
 0x1ba   :  { %vm152_vm7 = vcmp.eq.s32.totalorder %v69_v7, %v95_v34  ;;  %v107_v37 = vcvt.f32.s32 %v106_v35 }
 0x1bb   :  { %vm154_vm8 = vmand %vm150_vm6, %vm152_vm7 }
 0x1bc   :  { %v110_v38 = vadd.s32 %v109_v36, %v107_v37  ;;  %v157_v41 = vsel %vm154_vm8, 1, %v205_v4 }
 0x1bd   :  { %v149_v40 = vpop.permute.xlu1 %148  ;;  %v159_v46 = vsel %vm70_vm0, %v157_v41, 0 }
 0x1be   :  { %vm153_vm9 = vcmp.eq.s32.totalorder %v69_v7, %v110_v38  ;;  %vm151_vm10 = vcmp.eq.s32.totalorder %v69_v7, %v149_v40 }
 0x1bf   :  { %vm155_vm11 = vmand %vm151_vm10, %vm153_vm9  ;;  %v173_v42 = vsel %vm151_vm10, 1, %v205_v4 }
 0x1c0   :  { %v158_v44 = vsel %vm155_vm11, 1, %v205_v4  ;;  %v175_v45 = vsel %vm70_vm0, %v173_v42, 0 }
 0x1c1   :  { %v160_v47 = vsel %vm70_vm0, %v158_v44, 0  ;;  %v176_v48 = vadd.s32 %v175_v45, %v174_v43 }
 0x1c2   :  { %v161_v49 = vadd.s32 %v160_v47, %v159_v46 }
 0x1c3   :  { %v177_v50 = vrot.slane %v176_v48, 4 }
 0x1c4   :  { %v162_v51 = vrot.slane %v161_v49, 4 }
 0x1c5   :  { %v178_v52 = vadd.s32 %v177_v50, %v176_v48 }
 0x1c6   :  { %v163_v53 = vadd.s32 %v162_v51, %v161_v49 }
 0x1c7   :  { %v179_v54 = vrot.slane %v178_v52, 2 }
 0x1c8   :  { %v164_v55 = vrot.slane %v163_v53, 2 }
 0x1c9   :  { %v180_v56 = vadd.s32 %v179_v54, %v178_v52 }
 0x1ca   :  { %v165_v57 = vadd.s32 %v164_v55, %v163_v53 }
 0x1cb   :  { %v181_v58 = vrot.slane %v180_v56, 1 }
 0x1cc   :  { %v166_v60 = vrot.slane %v165_v57, 1 }
 0x1cd   :  { %v182_v62 = vadd.s32 %v181_v58, %v180_v56 }
 0x1ce   :  { %v167_v63 = vadd.s32 %v166_v60, %v165_v57 }
 0x1cf   :  { %v183_v0 = vadd.s32 %v182_v62, %v171_v59 }
 0x1d0   :  { %v168_v1 = vadd.s32 %v167_v63, %v156_v61 }
 0x1d1   :  { %184 = vst.msk [vmem:[%s276_s3] sm:$0x1] %vm63_vm5, %v183_v0 }
 0x1d2   :  { %170 = vst.msk [vmem:[%s275_s2] sm:$0x1] %vm63_vm5, %v168_v1 }

</bundles_post_ra>
